<compile_context>
chip_gen: v6e
topology: v6e:2x2x1
jax: 0.10.0
libtpu: 0.0.40
codegen_flags: <defaults>
</compile_context>

<pallas_src>
import functools

import jax
import jax.numpy as jnp
from jax.experimental import pallas as pl
from jax.experimental.pallas import tpu as pltpu

EPS = 1e-5
NEG_SLOPE = 0.2
_LANE = 128
_MIN_TILE = 256          # spatial (lane-axis) tile granularity when tiling is needed


def _tconv_block_kernel(x_ref, w_ref, o_ref, sum_ref, ssq_ref, shift_ref, *y_scratch,
                        inv_n, hw_true, tile, masked, resident):
    """Fused ConvTranspose2d(k=2,s=2,bias=False) + InstanceNorm2d + LeakyReLU(0.2).

    Channel-major layout (spatial on lanes):
      x_ref:     (1, C_in, tile)      f32 input tile (native NCHW, spatial-flattened)
      w_ref:     (4*C_out, C_in)      bf16 weight, row = (ki*2+kj)*C_out + c
      o_ref:     (1, 4*C_out, tile)   f32 conv result in the same row layout (written in pass 1)
      sum_ref:   (4*C_out, 1)         f32 scratch: running sum         -> inv_std (finalize)
      ssq_ref:   (4*C_out, 1)         f32 scratch: running sum((y-s)^2) -> -mean*inv_std
      shift_ref: (4*C_out, 1)         f32 scratch: per-channel shift (first-tile mean)
      y_scratch: optional (4*C_out, hw_pad) f32 scratch holding the full conv result
                 (resident-y fast path: pass 1 reads it instead of recomputing the matmul)

    grid = (batch, pass, hw_tile): pass 0 accumulates statistics, pass 1 normalizes+activates.
    """
    p = pl.program_id(1)
    t = pl.program_id(2)
    last_t = pl.num_programs(2) - 1
    c4 = w_ref.shape[0]
    c_out = c4 // 4

    def conv_tile():
        # stride-2 / kernel-2 transposed conv has no output overlap: one bf16 MXU matmul per
        # tile producing all 4 (ki,kj) sub-pixels, f32 accumulation.
        xb = x_ref[0].astype(jnp.bfloat16)                                    # (C_in, tile)
        return jnp.dot(w_ref[...], xb, preferred_element_type=jnp.float32)    # (4*C_out, tile)

    def fold_groups(col):
        # Row (ki*2+kj)*C_out + c belongs to channel c: fold the 4 (ki,kj) groups together.
        return (col[0 * c_out:1 * c_out] + col[1 * c_out:2 * c_out]
                + col[2 * c_out:3 * c_out] + col[3 * c_out:4 * c_out])        # (C_out, 1)

    def tile4(col):
        # Broadcast a (C_out, 1) per-channel vector back to the (4*C_out, 1) row layout.
        return jnp.concatenate([col, col, col, col], axis=0)

    col_start = t * tile
    if tile % _LANE == 0:
        col_start = pl.multiple_of(col_start, _LANE)

    @pl.when(p == 0)
    def _stats_pass():
        y = conv_tile()
        if resident:
            y_scratch[0][:, pl.ds(col_start, tile)] = y

        if masked:
            # Spatial axis was zero-padded to a tile multiple: keep pad columns out of stats.
            lane = jax.lax.broadcasted_iota(jnp.int32, (1, tile), 1)
            mask = lane < (hw_true - t * tile)

        @pl.when(t == 0)
        def _init():
            # Defensive: the pass-0 output block (b, 0, 0) is never flushed to HBM because its
            # block index does not change until pass 1 overwrites it; zero it anyway so nothing
            # undefined could ever be written back if that pipelining detail changes.
            o_ref[...] = jnp.zeros_like(o_ref)
            sum_ref[...] = jnp.zeros_like(sum_ref)
            ssq_ref[...] = jnp.zeros_like(ssq_ref)
            # Shifted-sums variance: shift ~ per-channel mean of the first tile, so
            # sum((y-shift)^2)/N - (mean-shift)^2 does not suffer from cancellation.
            s0 = jnp.sum(y, axis=1, keepdims=True)                            # (4*C_out, 1)
            shift_ref[...] = tile4(fold_groups(s0) * (1.0 / (4.0 * tile)))

        shift = shift_ref[...]
        if masked:
            contrib = jnp.where(mask, y, 0.0)
            centered = jnp.where(mask, y - shift, 0.0)
        else:
            contrib = y
            centered = y - shift
        sum_ref[...] += jnp.sum(contrib, axis=1, keepdims=True)
        ssq_ref[...] += jnp.sum(centered * centered, axis=1, keepdims=True)

        @pl.when(t == last_t)
        def _finalize():
            shift_c = shift_ref[...][:c_out]                                  # (C_out, 1)
            mean_c = fold_groups(sum_ref[...]) * inv_n
            m2_c = fold_groups(ssq_ref[...]) * inv_n
            var_c = jnp.maximum(m2_c - (mean_c - shift_c) ** 2, 0.0)          # clamp rounding
            istd_c = jax.lax.rsqrt(var_c + EPS)
            # Pass 1 becomes a single fused multiply-add: z = y * scale + bias.
            sum_ref[...] = tile4(istd_c)                  # scale
            ssq_ref[...] = tile4(-mean_c * istd_c)        # bias

    @pl.when(p == 1)
    def _normalize_pass():
        if resident:
            y = y_scratch[0][:, pl.ds(col_start, tile)]   # conv result resident in VMEM
        else:
            y = conv_tile()                               # bandwidth-hidden matmul recompute
        z = y * sum_ref[...] + ssq_ref[...]
        o_ref[0] = jnp.maximum(z, NEG_SLOPE * z).astype(o_ref.dtype)   # LeakyReLU(0.2)


def _vmem_capacity_bytes():
    try:
        return int(pltpu.get_tpu_info().vmem_capacity_bytes)
    except Exception:
        return 64 * 1024 * 1024   # conservative fallback (v7x-sized VMEM)


def _plan(hw, c_in, c4, budget_bytes):
    """Pick (tile_hw, hw_padded, resident_y) so double-buffered blocks fit the VMEM budget."""
    # Per spatial column (bytes): 2x f32 x block + 2x f32 out block + ~3 tile-sized f32 temps.
    per_col = 2 * 4 * c_in + 2 * 4 * c4 + 3 * 4 * c4
    # Grid-invariant bytes: bf16 weight (conservatively assume double-buffered; see Buffered(1)
    # TODO at the BlockSpec) plus three (4*C_out, 1) stat scratches (lane-padded by Mosaic).
    fixed = 2 * 2 * c4 * c_in + 3 * 4 * ((c4 + 7) // 8 * 8) * _LANE
    cap = max((budget_bytes - fixed) // per_col, _MIN_TILE)
    if hw <= cap:
        tile, hw_pad = hw, hw
    else:
        tile = max(_MIN_TILE, cap // _MIN_TILE * _MIN_TILE)
        hw_pad = pl.cdiv(hw, tile) * tile
    resident = fixed + per_col * tile + 4 * c4 * hw_pad <= budget_bytes
    return tile, hw_pad, resident


def transpose_conv_block(x_nchw: jax.Array, weight_pt: jax.Array, *, plan_override=None):
    """Forward pass equivalent to the PyTorch TransposeConvBlock.

    x_nchw:    (N, C_in, H, W)       float32
    weight_pt: (C_in, C_out, 2, 2)   float32  (PyTorch ConvTranspose2d weight layout)
    returns:   (N, C_out, 2H, 2W)    float32
    """
    n, c_in, h, w = x_nchw.shape
    c_out = weight_pt.shape[1]
    hw = h * w
    c4 = 4 * c_out

    # Weight rows ordered (ki*2+kj)*C_out + c; tiny, bf16 for the MXU.
    w_mat = jnp.transpose(weight_pt, (2, 3, 1, 0)).reshape(c4, c_in).astype(jnp.bfloat16)
    # x is consumed in its native NCHW layout: a free reshape, no transpose / cast pre-pass.
    x3 = x_nchw.reshape(n, c_in, hw)

    capacity = _vmem_capacity_bytes()
    vmem_limit = 3 * capacity // 4    # 48 MiB on v7x (64 MiB parts), 96 MiB on v5e/v6e (128 MiB)
    budget = 5 * capacity // 8        # 40 MiB on v7x,                80 MiB on v5e/v6e

    if plan_override is None:
        tile, hw_pad, resident = _plan(hw, c_in, c4, budget)
    else:                             # test hook: force the tiled / masked paths
        tile = int(plan_override["tile"])
        resident = bool(plan_override["resident"])
        hw_pad = pl.cdiv(hw, tile) * tile
    masked = hw_pad != hw
    if masked:
        x3 = jnp.pad(x3, ((0, 0), (0, 0), (0, hw_pad - hw)))
    n_tiles = hw_pad // tile

    kernel = functools.partial(
        _tconv_block_kernel,
        inv_n=1.0 / float(4 * hw), hw_true=hw, tile=tile, masked=masked, resident=resident)

    scratch_shapes = [
        pltpu.VMEM((c4, 1), jnp.float32),   # running sum        -> inv_std       (finalize)
        pltpu.VMEM((c4, 1), jnp.float32),   # running sum((y-s)^2) -> -mean*inv_std (finalize)
        pltpu.VMEM((c4, 1), jnp.float32),   # shifted-variance shift
    ]
    if resident:
        scratch_shapes.append(pltpu.VMEM((c4, hw_pad), jnp.float32))   # resident conv result

    if resident:
        # Pass 1 reads y from VMEM: pin the x block so it is not re-streamed from HBM.
        x_map = lambda b, p, t: (b, 0, t * (1 - p))
    else:
        x_map = lambda b, p, t: (b, 0, t)

    out = pl.pallas_call(
        kernel,
        out_shape=jax.ShapeDtypeStruct((n, c4, hw_pad), jnp.float32),
        grid_spec=pltpu.PrefetchScalarGridSpec(
            num_scalar_prefetch=0,
            grid=(n, 2, n_tiles),           # (batch, pass, spatial tile)
            in_specs=[
                pl.BlockSpec((1, c_in, tile), x_map),
                # TODO(synk): pipeline_mode=pl.Buffered(1) would stop double-buffering this
                # grid-invariant weight and reclaim its VMEM (review item #6).
                pl.BlockSpec((c4, c_in), lambda b, p, t: (0, 0)),
            ],
            # Pass 0 keeps the output block index pinned at (b, 0, 0) (defensively zeroed,
            # never flushed); pass 1 writes each output tile exactly once.
            out_specs=pl.BlockSpec((1, c4, tile), lambda b, p, t: (b, 0, t * p)),
            scratch_shapes=scratch_shapes,
        ),
        compiler_params=pltpu.CompilerParams(
            # TODO(synk): on v7x (2 TensorCores) add a second parallel grid axis (channel-group
            # split, or per-core spatial split with a stats combine) so batch=1 uses both cores.
            dimension_semantics=("parallel", "arbitrary", "arbitrary"),
            vmem_limit_bytes=vmem_limit,
        ),
    )(x3, w_mat)

    # Epilogue (single XLA pass): drop spatial padding, scatter the 4 (ki,kj) sub-pixel planes
    # into the 2x-upsampled grid and return NCHW.  See header note on why this stays in XLA.
    y = out[:, :, :hw].reshape(n, 2, 2, c_out, h, w)        # (N, ki, kj, C_out, H, W)
    y = jnp.transpose(y, (0, 3, 4, 1, 5, 2))                # (N, C_out, H, ki, W, kj)
    return y.reshape(n, c_out, 2 * h, 2 * w)


def _reference(x_nchw: jax.Array, weight_pt: jax.Array) -> jax.Array:
    """Pure-JAX reference of ConvTranspose2d(k=2,s=2,no bias) + InstanceNorm2d + LeakyReLU."""
    n, c_in, h, w = x_nchw.shape
    c_out = weight_pt.shape[1]
    x_nhwc = jnp.transpose(x_nchw, (0, 2, 3, 1))
    t = jnp.einsum("nhwi,iokl->nhklwo", x_nhwc, weight_pt)   # (N, H, ki, kj, W, C_out)
    t = jnp.transpose(t, (0, 1, 2, 4, 3, 5))                 # (N, H, ki, W, kj, C_out)
    y = t.reshape(n, 2 * h, 2 * w, c_out)
    mean = jnp.mean(y, axis=(1, 2), keepdims=True)
    var = jnp.mean((y - mean) ** 2, axis=(1, 2), keepdims=True)
    normed = (y - mean) / jnp.sqrt(var + EPS)
    act = jnp.where(normed >= 0, normed, NEG_SLOPE * normed)
    return jnp.transpose(act, (0, 3, 1, 2))


if __name__ == "__main__":
    key = jax.random.PRNGKey(0)
    k_x, k_w, k_x2 = jax.random.split(key, 3)

    batch, in_channels, out_channels, spatial = 2, 8, 4, 16
    x = jax.random.normal(k_x, (batch, in_channels, spatial, spatial), dtype=jnp.float32)
    weight = 0.1 * jax.random.normal(k_w, (in_channels, out_channels, 2, 2), dtype=jnp.float32)

    def check(out, xin, tag):
        # Tight check: reference whose conv sees the same bf16-rounded inputs as the MXU path.
        x_bf = xin.astype(jnp.bfloat16).astype(jnp.float32)
        w_bf = weight.astype(jnp.bfloat16).astype(jnp.float32)
        ref_matched = _reference(x_bf, w_bf)
        assert out.shape == ref_matched.shape, f"{tag}: shape {out.shape}"
        assert jnp.allclose(out, ref_matched, atol=2e-3, rtol=2e-3), f"{tag}: bf16-matched ref"
        # Loose check against exact f32 module semantics.
        ref_f32 = _reference(xin, weight)
        assert jnp.allclose(out, ref_f32, atol=5e-2, rtol=5e-2), f"{tag}: f32 ref"

    # 1) Default plan: resident-y fast path (single spatial tile) for this shape.
    out = jax.block_until_ready(transpose_conv_block(x, weight))
    check(out, x, "default/resident")

    # 2) Force the general tiled two-pass path (matmul recompute, multi-tile stats).
    out_tiled = jax.block_until_ready(
        transpose_conv_block(x, weight, plan_override={"tile": 128, "resident": False}))
    check(out_tiled, x, "tiled/recompute")

    # 3) Non-divisible spatial size -> zero-padded spatial axis + masked statistics.
    x_odd = jax.random.normal(k_x2, (batch, in_channels, 12, 16), dtype=jnp.float32)
    out_masked = jax.block_until_ready(
        transpose_conv_block(x_odd, weight, plan_override={"tile": 128, "resident": True}))
    check(out_masked, x_odd, "masked/padded")

    print("KERNEL_OK")
</pallas_src>

<mosaic_0001>
module attributes {stable_mosaic.version = 11 : i64} {
  func.func @_tconv_block_kernel(%arg0: i32, %arg1: i32, %arg2: i32, %arg3: memref<1x8x256xf32, #tpu.memory_space<vmem>>, %arg4: memref<16x8xbf16, #tpu.memory_space<vmem>>, %arg5: memref<1x16x256xf32, #tpu.memory_space<vmem>>, %arg6: memref<16x1xf32, #tpu.memory_space<vmem>>, %arg7: memref<16x1xf32, #tpu.memory_space<vmem>>, %arg8: memref<16x1xf32, #tpu.memory_space<vmem>>, %arg9: memref<16x256xf32, #tpu.memory_space<vmem>>) attributes {dimension_semantics = [#tpu.dimension_semantics<parallel>, #tpu.dimension_semantics<arbitrary>, #tpu.dimension_semantics<arbitrary>], iteration_bounds = array<i64: 2, 2, 1>, scalar_prefetch = 0 : i64, scratch_operands = 4 : i64, tpu.core_type = #tpu.core_type<tc>, window_params = [{transform_indices = @transform_0, window_bounds = array<i64: 1, 8, 256>}, {pipeline_mode = #tpu.pipeline_mode<synchronous>, transform_indices = @transform_1, window_bounds = array<i64: 16, 8>}, {transform_indices = @transform_2, window_bounds = array<i64: 1, 16, 256>}]} {
    %c256_i32 = arith.constant 256 : i32
    %0 = arith.muli %arg2, %c256_i32 : i32
    %1 = tpu.assume_multiple %0, 128 : i32
    %c0_i32 = arith.constant 0 : i32
    %2 = arith.cmpi eq, %arg1, %c0_i32 : i32
    %3 = arith.extui %2 : i1 to i32
    %c0_i32_0 = arith.constant 0 : i32
    %4 = arith.cmpi ne, %3, %c0_i32_0 : i32
    scf.if %4 {
      %c0 = arith.constant 0 : index
      %c0_2 = arith.constant 0 : index
      %c0_3 = arith.constant 0 : index
      %8 = vector.load %arg3[%c0, %c0_2, %c0_3] : memref<1x8x256xf32, #tpu.memory_space<vmem>>, vector<1x8x256xf32>
      %9 = vector.shape_cast %8 : vector<1x8x256xf32> to vector<8x256xf32>
      %10 = arith.truncf %9 : vector<8x256xf32> to vector<8x256xbf16>
      %c0_4 = arith.constant 0 : index
      %c0_5 = arith.constant 0 : index
      %11 = vector.load %arg4[%c0_4, %c0_5] : memref<16x8xbf16, #tpu.memory_space<vmem>>, vector<16x8xbf16>
      %cst = arith.constant dense<0.000000e+00> : vector<16x256xf32>
      %12 = tpu.matmul %11, %10, %cst {dimension_numbers = #tpu.dot_dimension_numbers<[1], [0], [0], [1], [0, 0, 1, 1], [], []>} : vector<16x8xbf16>, vector<8x256xbf16>, vector<16x256xf32> -> vector<16x256xf32>
      %c0_6 = arith.constant 0 : index
      %13 = arith.index_cast %1 : i32 to index
      %14 = vector.load %arg9[%c0_6, %13] : memref<16x256xf32, #tpu.memory_space<vmem>>, vector<16x256xf32>
      tpu.vector_store %arg9[%c0_6, %13], %12 {strides = array<i32>} : memref<16x256xf32, #tpu.memory_space<vmem>>, vector<16x256xf32>,
      %c0_i32_7 = arith.constant 0 : i32
      %15 = arith.cmpi eq, %arg2, %c0_i32_7 : i32
      %16 = arith.extui %15 : i1 to i32
      %c0_i32_8 = arith.constant 0 : i32
      %17 = arith.cmpi ne, %16, %c0_i32_8 : i32
      scf.if %17 {
        %cst_23 = arith.constant 0.000000e+00 : f32
        %35 = vector.broadcast %cst_23 : f32 to vector<1x16x256xf32>
        %c0_24 = arith.constant 0 : index
        %c0_25 = arith.constant 0 : index
        %c0_26 = arith.constant 0 : index
        %36 = vector.load %arg5[%c0_24, %c0_25, %c0_26] : memref<1x16x256xf32, #tpu.memory_space<vmem>>, vector<1x16x256xf32>
        tpu.vector_store %arg5[%c0_24, %c0_25, %c0_26], %35 {strides = array<i32>} : memref<1x16x256xf32, #tpu.memory_space<vmem>>, vector<1x16x256xf32>,
        %cst_27 = arith.constant 0.000000e+00 : f32
        %37 = vector.broadcast %cst_27 : f32 to vector<16x1xf32>
        %c0_28 = arith.constant 0 : index
        %c0_29 = arith.constant 0 : index
        %38 = vector.load %arg6[%c0_28, %c0_29] : memref<16x1xf32, #tpu.memory_space<vmem>>, vector<16x1xf32>
        tpu.vector_store %arg6[%c0_28, %c0_29], %37 {strides = array<i32>} : memref<16x1xf32, #tpu.memory_space<vmem>>, vector<16x1xf32>,
        %cst_30 = arith.constant 0.000000e+00 : f32
        %39 = vector.broadcast %cst_30 : f32 to vector<16x1xf32>
        %c0_31 = arith.constant 0 : index
        %c0_32 = arith.constant 0 : index
        %40 = vector.load %arg7[%c0_31, %c0_32] : memref<16x1xf32, #tpu.memory_space<vmem>>, vector<16x1xf32>
        tpu.vector_store %arg7[%c0_31, %c0_32], %39 {strides = array<i32>} : memref<16x1xf32, #tpu.memory_space<vmem>>, vector<16x1xf32>,
        %cst_33 = arith.constant dense<0.000000e+00> : vector<16xf32>
        %41 = vector.multi_reduction <add>, %12, %cst_33 [1] : vector<16x256xf32> to vector<16xf32>
        %42 = vector.shape_cast %41 : vector<16xf32> to vector<16x1xf32>
        %43 = vector.extract_strided_slice %42 {offsets = [0, 0], sizes = [4, 1], strides = [1, 1]} : vector<16x1xf32> to vector<4x1xf32>
        %44 = vector.extract_strided_slice %42 {offsets = [4, 0], sizes = [4, 1], strides = [1, 1]} : vector<16x1xf32> to vector<4x1xf32>
        %45 = arith.addf %43, %44 : vector<4x1xf32>
        %46 = vector.extract_strided_slice %42 {offsets = [8, 0], sizes = [4, 1], strides = [1, 1]} : vector<16x1xf32> to vector<4x1xf32>
        %47 = arith.addf %45, %46 : vector<4x1xf32>
        %48 = vector.extract_strided_slice %42 {offsets = [12, 0], sizes = [4, 1], strides = [1, 1]} : vector<16x1xf32> to vector<4x1xf32>
        %49 = arith.addf %47, %48 : vector<4x1xf32>
        %cst_34 = arith.constant 9.765625E-4 : f32
        %50 = vector.broadcast %cst_34 : f32 to vector<4x1xf32>
        %51 = arith.mulf %49, %50 : vector<4x1xf32>
        %52 = tpu.concatenate %51, %51, %51, %51 in 0 : vector<4x1xf32>, vector<4x1xf32>, vector<4x1xf32>, vector<4x1xf32> -> vector<16x1xf32>
        %c0_35 = arith.constant 0 : index
        %c0_36 = arith.constant 0 : index
        %53 = vector.load %arg8[%c0_35, %c0_36] : memref<16x1xf32, #tpu.memory_space<vmem>>, vector<16x1xf32>
        tpu.vector_store %arg8[%c0_35, %c0_36], %52 {strides = array<i32>} : memref<16x1xf32, #tpu.memory_space<vmem>>, vector<16x1xf32>,
      } else {
      }
      %c0_9 = arith.constant 0 : index
      %c0_10 = arith.constant 0 : index
      %18 = vector.load %arg8[%c0_9, %c0_10] : memref<16x1xf32, #tpu.memory_space<vmem>>, vector<16x1xf32>
      %19 = vector.broadcast %18 : vector<16x1xf32> to vector<16x256xf32>
      %20 = arith.subf %12, %19 : vector<16x256xf32>
      %c0_11 = arith.constant 0 : index
      %c0_12 = arith.constant 0 : index
      %21 = vector.load %arg6[%c0_11, %c0_12] : memref<16x1xf32, #tpu.memory_space<vmem>>, vector<16x1xf32>
      %cst_13 = arith.constant dense<0.000000e+00> : vector<16xf32>
      %22 = vector.multi_reduction <add>, %12, %cst_13 [1] : vector<16x256xf32> to vector<16xf32>
      %23 = vector.shape_cast %22 : vector<16xf32> to vector<16x1xf32>
      %24 = arith.addf %21, %23 : vector<16x1xf32>
      %c0_14 = arith.constant 0 : index
      %c0_15 = arith.constant 0 : index
      %25 = vector.load %arg6[%c0_14, %c0_15] : memref<16x1xf32, #tpu.memory_space<vmem>>, vector<16x1xf32>
      tpu.vector_store %arg6[%c0_14, %c0_15], %24 {strides = array<i32>} : memref<16x1xf32, #tpu.memory_space<vmem>>, vector<16x1xf32>,
      %c0_16 = arith.constant 0 : index
      %c0_17 = arith.constant 0 : index
      %26 = vector.load %arg7[%c0_16, %c0_17] : memref<16x1xf32, #tpu.memory_space<vmem>>, vector<16x1xf32>
      %27 = arith.mulf %20, %20 : vector<16x256xf32>
      %cst_18 = arith.constant dense<0.000000e+00> : vector<16xf32>
      %28 = vector.multi_reduction <add>, %27, %cst_18 [1] : vector<16x256xf32> to vector<16xf32>
      %29 = vector.shape_cast %28 : vector<16xf32> to vector<16x1xf32>
      %30 = arith.addf %26, %29 : vector<16x1xf32>
      %c0_19 = arith.constant 0 : index
      %c0_20 = arith.constant 0 : index
      %31 = vector.load %arg7[%c0_19, %c0_20] : memref<16x1xf32, #tpu.memory_space<vmem>>, vector<16x1xf32>
      tpu.vector_store %arg7[%c0_19, %c0_20], %30 {strides = array<i32>} : memref<16x1xf32, #tpu.memory_space<vmem>>, vector<16x1xf32>,
      %c0_i32_21 = arith.constant 0 : i32
      %32 = arith.cmpi eq, %arg2, %c0_i32_21 : i32
      %33 = arith.extui %32 : i1 to i32
      %c0_i32_22 = arith.constant 0 : i32
      %34 = arith.cmpi ne, %33, %c0_i32_22 : i32
      scf.if %34 {
        %c0_23 = arith.constant 0 : index
        %c0_24 = arith.constant 0 : index
        %35 = vector.load %arg8[%c0_23, %c0_24] : memref<16x1xf32, #tpu.memory_space<vmem>>, vector<16x1xf32>
        %36 = vector.extract_strided_slice %35 {offsets = [0, 0], sizes = [4, 1], strides = [1, 1]} : vector<16x1xf32> to vector<4x1xf32>
        %c0_25 = arith.constant 0 : index
        %c0_26 = arith.constant 0 : index
        %37 = vector.load %arg6[%c0_25, %c0_26] : memref<16x1xf32, #tpu.memory_space<vmem>>, vector<16x1xf32>
        %38 = vector.extract_strided_slice %37 {offsets = [0, 0], sizes = [4, 1], strides = [1, 1]} : vector<16x1xf32> to vector<4x1xf32>
        %39 = vector.extract_strided_slice %37 {offsets = [4, 0], sizes = [4, 1], strides = [1, 1]} : vector<16x1xf32> to vector<4x1xf32>
        %40 = arith.addf %38, %39 : vector<4x1xf32>
        %41 = vector.extract_strided_slice %37 {offsets = [8, 0], sizes = [4, 1], strides = [1, 1]} : vector<16x1xf32> to vector<4x1xf32>
        %42 = arith.addf %40, %41 : vector<4x1xf32>
        %43 = vector.extract_strided_slice %37 {offsets = [12, 0], sizes = [4, 1], strides = [1, 1]} : vector<16x1xf32> to vector<4x1xf32>
        %44 = arith.addf %42, %43 : vector<4x1xf32>
        %cst_27 = arith.constant 9.765625E-4 : f32
        %45 = vector.broadcast %cst_27 : f32 to vector<4x1xf32>
        %46 = arith.mulf %44, %45 : vector<4x1xf32>
        %c0_28 = arith.constant 0 : index
        %c0_29 = arith.constant 0 : index
        %47 = vector.load %arg7[%c0_28, %c0_29] : memref<16x1xf32, #tpu.memory_space<vmem>>, vector<16x1xf32>
        %48 = vector.extract_strided_slice %47 {offsets = [0, 0], sizes = [4, 1], strides = [1, 1]} : vector<16x1xf32> to vector<4x1xf32>
        %49 = vector.extract_strided_slice %47 {offsets = [4, 0], sizes = [4, 1], strides = [1, 1]} : vector<16x1xf32> to vector<4x1xf32>
        %50 = arith.addf %48, %49 : vector<4x1xf32>
        %51 = vector.extract_strided_slice %47 {offsets = [8, 0], sizes = [4, 1], strides = [1, 1]} : vector<16x1xf32> to vector<4x1xf32>
        %52 = arith.addf %50, %51 : vector<4x1xf32>
        %53 = vector.extract_strided_slice %47 {offsets = [12, 0], sizes = [4, 1], strides = [1, 1]} : vector<16x1xf32> to vector<4x1xf32>
        %54 = arith.addf %52, %53 : vector<4x1xf32>
        %cst_30 = arith.constant 9.765625E-4 : f32
        %55 = vector.broadcast %cst_30 : f32 to vector<4x1xf32>
        %56 = arith.mulf %54, %55 : vector<4x1xf32>
        %57 = arith.subf %46, %36 : vector<4x1xf32>
        %58 = arith.mulf %57, %57 : vector<4x1xf32>
        %59 = arith.subf %56, %58 : vector<4x1xf32>
        %cst_31 = arith.constant 0.000000e+00 : f32
        %60 = vector.broadcast %cst_31 : f32 to vector<4x1xf32>
        %61 = arith.maximumf %59, %60 : vector<4x1xf32>
        %cst_32 = arith.constant 9.99999974E-6 : f32
        %62 = vector.broadcast %cst_32 : f32 to vector<4x1xf32>
        %63 = arith.addf %61, %62 : vector<4x1xf32>
        %64 = math.rsqrt %63 : vector<4x1xf32>
        %65 = tpu.concatenate %64, %64, %64, %64 in 0 : vector<4x1xf32>, vector<4x1xf32>, vector<4x1xf32>, vector<4x1xf32> -> vector<16x1xf32>
        %c0_33 = arith.constant 0 : index
        %c0_34 = arith.constant 0 : index
        %66 = vector.load %arg6[%c0_33, %c0_34] : memref<16x1xf32, #tpu.memory_space<vmem>>, vector<16x1xf32>
        tpu.vector_store %arg6[%c0_33, %c0_34], %65 {strides = array<i32>} : memref<16x1xf32, #tpu.memory_space<vmem>>, vector<16x1xf32>,
        %cst_35 = arith.constant 0.000000e+00 : f32
        %67 = vector.broadcast %cst_35 : f32 to vector<4x1xf32>
        %68 = arith.subf %67, %46 : vector<4x1xf32>
        %69 = arith.mulf %68, %64 : vector<4x1xf32>
        %70 = tpu.concatenate %69, %69, %69, %69 in 0 : vector<4x1xf32>, vector<4x1xf32>, vector<4x1xf32>, vector<4x1xf32> -> vector<16x1xf32>
        %c0_36 = arith.constant 0 : index
        %c0_37 = arith.constant 0 : index
        %71 = vector.load %arg7[%c0_36, %c0_37] : memref<16x1xf32, #tpu.memory_space<vmem>>, vector<16x1xf32>
        tpu.vector_store %arg7[%c0_36, %c0_37], %70 {strides = array<i32>} : memref<16x1xf32, #tpu.memory_space<vmem>>, vector<16x1xf32>,
      } else {
      }
    } else {
    }
    %c1_i32 = arith.constant 1 : i32
    %5 = arith.cmpi eq, %arg1, %c1_i32 : i32
    %6 = arith.extui %5 : i1 to i32
    %c0_i32_1 = arith.constant 0 : i32
    %7 = arith.cmpi ne, %6, %c0_i32_1 : i32
    scf.if %7 {
      %c0 = arith.constant 0 : index
      %8 = arith.index_cast %1 : i32 to index
      %9 = vector.load %arg9[%c0, %8] : memref<16x256xf32, #tpu.memory_space<vmem>>, vector<16x256xf32>
      %c0_2 = arith.constant 0 : index
      %c0_3 = arith.constant 0 : index
      %10 = vector.load %arg6[%c0_2, %c0_3] : memref<16x1xf32, #tpu.memory_space<vmem>>, vector<16x1xf32>
      %11 = vector.broadcast %10 : vector<16x1xf32> to vector<16x256xf32>
      %12 = arith.mulf %9, %11 : vector<16x256xf32>
      %c0_4 = arith.constant 0 : index
      %c0_5 = arith.constant 0 : index
      %13 = vector.load %arg7[%c0_4, %c0_5] : memref<16x1xf32, #tpu.memory_space<vmem>>, vector<16x1xf32>
      %14 = vector.broadcast %13 : vector<16x1xf32> to vector<16x256xf32>
      %15 = arith.addf %12, %14 : vector<16x256xf32>
      %cst = arith.constant 2.000000e-01 : f32
      %16 = vector.broadcast %cst : f32 to vector<16x256xf32>
      %17 = arith.mulf %16, %15 : vector<16x256xf32>
      %18 = arith.maximumf %15, %17 : vector<16x256xf32>
      %c0_6 = arith.constant 0 : index
      %c0_7 = arith.constant 0 : index
      %c0_8 = arith.constant 0 : index
      %19 = vector.load %arg5[%c0_6, %c0_7, %c0_8] : memref<1x16x256xf32, #tpu.memory_space<vmem>>, vector<1x16x256xf32>
      %20 = vector.shape_cast %19 : vector<1x16x256xf32> to vector<16x256xf32>
      %21 = vector.shape_cast %18 : vector<16x256xf32> to vector<1x16x256xf32>
      tpu.vector_store %arg5[%c0_6, %c0_7, %c0_8], %21 {strides = array<i32>} : memref<1x16x256xf32, #tpu.memory_space<vmem>>, vector<1x16x256xf32>,
    } else {
    }
    return
  }
  func.func @transform_0(%arg0: i32, %arg1: i32, %arg2: i32) -> (i32, i32, i32) {
    %c1_i32 = arith.constant 1 : i32
    %0 = arith.subi %c1_i32, %arg1 : i32
    %1 = arith.muli %arg2, %0 : i32
    %c0_i32 = arith.constant 0 : i32
    %c0_i32_0 = arith.constant 0 : i32
    return %arg0, %c0_i32, %1 : i32, i32, i32
  }
  func.func @transform_1(%arg0: i32, %arg1: i32, %arg2: i32) -> (i32, i32) {
    %c0_i32 = arith.constant 0 : i32
    %c0_i32_0 = arith.constant 0 : i32
    %c0_i32_1 = arith.constant 0 : i32
    return %c0_i32, %c0_i32_0 : i32, i32
  }
  func.func @transform_2(%arg0: i32, %arg1: i32, %arg2: i32) -> (i32, i32, i32) {
    %0 = arith.muli %arg2, %arg1 : i32
    %c0_i32 = arith.constant 0 : i32
    %c0_i32_0 = arith.constant 0 : i32
    return %arg0, %c0_i32, %0 : i32, i32, i32
  }
}

</mosaic_0001>

<bundles_post_ra>
// kernel: tpu_custom_call.1
= control target key start
LH: loop header
LB: loop body
LE: loop exit
PB: predicated region body
PF: predicated region fallthrough
CT: control target
= control target key end

     0   :  { %7 = vsyncpa [#allocation7], 0  ;;  %s1037_s0 = inlined_call_operand.hbm [shape: f32[2,8,256], index: 0, kind: input, shape index: {}]   ;;  %s1038_s1 = inlined_call_operand.vmem [shape: bf16[16,8], index: 1, kind: input, shape index: {}]   ;;  %s1039_s2 = inlined_call_operand.hbm [shape: f32[2,16,256], index: 2, kind: output, shape index: {}]  }
   0x1   :  { %9 = vsyncpa [#allocation7 + $0x1], 0 }
   0x2   :  { %10 = vsyncpa [#allocation8], 0 }
   0x3   :  { %12 = vsyncpa [#allocation8 + $0x1], 0  ;;  %s835_s9 = smov 0   ;;  %s837_s10 = smov 0  }
   0x4   :  { %s839_s11 = smov 0   ;;  %s841_s12 = smov 0  }
   0x5   :  { %s843_s13 = smov 0   ;;  %s845_s14 = smov 0  }
   0x6   :  { %s847_s15 = smov 0   ;;  %s849_s16 = smov 0  }
   0x7 LB: > { %s575_s17 = sadd.s32 4294967295, %s811_s16   ;;  %s576_s18 = sadd.s32 4294967294, %s811_s16   ;;  %s811_s16 = sphi %s849_s16, %s18_s16   ;;  %s807_s15 = sphi %s847_s15, %s1052_s15   ;;  %s803_s14 = sphi %s845_s14, %s1051_s14   ;;  %s799_s13 = sphi %s843_s13, %s1050_s13   ;;  %s795_s12 = sphi %s841_s12, %s1049_s12   ;;  %s791_s11 = sphi %s839_s11, %s1048_s11   ;;  %s787_s10 = sphi %s837_s10, %s1047_s10   ;;  %s783_s9 = sphi %s835_s9, %s1046_s9  }
   0x8   : > { %s33_s19 = sadd.s32 1, %s803_s14  ;;  %s37_s20 = sadd.s32 1, %s807_s15 }
   0x9   : > { %p35_p0 = scmp.ge.s32.totalorder %s33_s19, 2  ;;  %s50_s21 = sadd.s32 1, %s791_s11 }
   0xa   : > { %p57_p1 = scmp.ne.s32.totalorder %s791_s11, %s787_s10  ;;  %p58_p2 = scmp.eq.s32.totalorder %s811_s16, 0 }
   0xb   : > { %s1054_s19 = smov (%p35_p0, %s33_s19), 0  ;;  %s1056_s20 = smov (!%p35_p0, %s37_s20), %s807_s15 }
   0xc   : > { %p886_p3 = por %p58_p2, %p57_p1  ;;  %p63_p4 = scmp.ne.s32.totalorder %s787_s10, %s783_s9 }
   0xd   : > { %p39_p5 = scmp.ge.s32.totalorder %s1056_s20, 2  ;;  %p64_p6 = scmp.eq.s32.totalorder %s575_s17, 0 }
   0xe   : > { %p112_p7 = scmp.eq.s32.totalorder %s575_s17, 3  ;;  %p118_p8 = scmp.eq.s32.totalorder %s576_s18, 3 }
   0xf   : > { %s1058_s20 = smov (%p39_p5, %s1056_s20), 0  ;;  %p894_p9 = por %p64_p6, %p63_p4 }
  0x10   : > { %p898_p10 = por %p112_p7, %p57_p1  ;;  %s45_s25 = ssub.s32 %s807_s15, %s1058_s20 }
  0x11   : > { %p904_p11 = por %p118_p8, %p63_p4  ;;  %p48_p12 = scmp.eq.s32.totalorder %s45_s25, 0 }
  0x12   : > { %p609_p13 = scmp.lt.s32.totalorder %s811_s16, 4  ;;  %s141_s27 = sand.u32 1, %s791_s11  }
  0x13   : > { %s1043_s26 = scalar_select %p904_p11, 1, 0 }
  0x14   : > { %s911_s28 = scalar_select %p48_p12, %s791_s11, %s50_s21  }
  0x15   : > { %s579_s29 = sshll.u32 %s141_s27, 4  ;;  %s595_s30 = sshll.u32 %s807_s15, 8 }
  0x16   : > { %s155_s5 = scalar_lea.hbm %s1037_s0, %s595_s30  ;;  %s145_s6 = scalar_lea.vmem [#allocation6], %s579_s29 }
  0x17   : > { %s157_s7 = sshll.u32 %s145_s6, 4  ;;  %p919_p0 = pnand %p609_p13, %p886_p3  ;;  %s158_s7 = int_to_ptr.vmem [resolvable:$true] %s157_s7 }
  0x18   : > { %p582_p1 = scmp.ge.s32.totalorder %s811_s16, 1  ;;  %p162_p2 = scmp.lt.s32.totalorder %s811_s16, 5 }
  0x19   : > { %s142_s17 = scalar_lea.sflag [#allocation7], %s141_s27  ;;  %p689_p4 = pneg %p919_p0 }
  0x1a   : > { %s700_s18 = scalar_lea.vmem %s158_s7, 256  ;;  %s813_s21 = smov [#allocation6]  }
  0x1b   : > { %p701_p5 = scmp.ne.s32.totalorder %s158_s7, %s700_s18  ;;  %s705_s25 = sshll.u32 %s813_s21, 4  ;;  %s706_s25 = int_to_ptr.vmem [resolvable:$false] %s705_s25 }
  0x1c   : > { %s707_s29 = scalar_lea.vmem %s706_s25, 512  ;;  %p708_p8 = scmp.lt.s32.totalorder %s158_s7, %s706_s25 }
  0x1d   : > { %p703_p6 = pnand %p701_p5, %p689_p4  ;;  %p709_p12 = scmp.lt.s32.totalorder %s707_s29, %s700_s18 }
  0x1f   : > { %p704_p7 = pneg %p703_p6  ;;  %p710_p3 = por %p709_p12, %p708_p8 }
  0x21   : > { %p711_p13 = pnand %p710_p3, %p704_p7 }
  0x23   : > { %714 = shalt.err (!%p711_p13)
}
  0x24   : > { %604 = dma.hbm_to_vmem [thread:$0]  (!%p919_p0), %s155_s5, 256, %s158_s7, %s142_s17  }
  0x25   : > { %p163_p11 = pnand %p582_p1, %p162_p2 }
  0x26   : > { %s934_s22 = sand.u32 (!%p163_p11), 1, %s787_s10  }
  0x27   : > { %166 = sbr.rel (%p163_p11) target bundleno = 899 (0x383), region = 28  ;;  %s583_s27 = sshll.u32 (!%p163_p11), %s934_s22, 4 }
  0x28   : > { %s169_s30 = scalar_lea.sflag (!%p163_p11), [#allocation7], %s934_s22  ;;  %s172_s3 = scalar_lea.vmem (!%p163_p11), [#allocation6], %s583_s27 }
  0x2c   : > { %774 = dma.done.wait (%p894_p9), %s169_s30, 256  }
  0x2d   : > { %776 = vsyncadd (%p894_p9), %s169_s30, 4294967040  ;;  %s584_s4 = sshll.u32 %s934_s22, 5  ;;  %p585_p11 = scmp.ne.s32.totalorder %s795_s12, 0 }
  0x2e   : > { %s943_s5 = scalar_lea.vmem [#allocation9], %s584_s4 }
  0x2f   : > { %203 = sbr.rel (%p585_p11) target bundleno = 729 (0x2d9), region = 36 }
  0x34   : > { %v205_v0 = vld [vmem:[%s172_s3 + $0x8] sm:$0xff]  ;;  %vm219_vm0 = vcmask 1043456   ;;  %v204_v1 = vld [vmem:[%s172_s3] sm:$0xff]  ;;  %v814_v4 = vmov 0   ;;  %vm215_vm1 = vcmask 64512   ;;  %vm285_vm2 = vcmask 7168  }
  0x35   : > { %v207_v2 = vpack.c.bf16 %v205_v0, %v205_v0  ;;  %v206_v3 = vpack.c.bf16 %v204_v1, %v204_v1  ;;  %258 = vmatprep.mubr.bf16.mxu0 %v814_v4  ;;  %680 = vset.pattern.permute.xlu1 %v814_v4  ;;  %v682_v6 = vld [vmem:[%s1038_s1] sm:$0xff]   ;;  %v815_v13 = vmov 0.0  }
  0x36   : > { %681 = vset.pattern.permute.xlu0 %v814_v4  ;;  %281 = vst [vmem:[%s943_s5] sm:$0xff] %v815_v13  ;;  %282 = vst [vmem:[%s943_s5 + $0x8] sm:$0xff] %v815_v13 }
  0x37   : > { %587 = vmatprep.subr.msk.bf16.mxu0 %vm219_vm0, %v207_v2  ;;  %v221_v5 = vsel %vm219_vm0, %v206_v3, 0  ;;  %283 = vst [vmem:[%s943_s5 + $0x10] sm:$0xff] %v815_v13  ;;  %284 = vst [vmem:[%s943_s5 + $0x18] sm:$0xff] %v815_v13 }
  0x38   : > { %241 = vmatpush1.bf16.msra.mxu0 %v221_v5  ;;  %286 = vst.msk [vmem:[#allocation2] sm:$0xff] %vm285_vm2, %v815_v13  ;;  %287 = vst.msk [vmem:[#allocation2 + $0x8] sm:$0xff] %vm285_vm2, %v815_v13 }
  0x39   : > { %288 = vst.msk [vmem:[#allocation3] sm:$0xff] %vm285_vm2, %v815_v13  ;;  %289 = vst.msk [vmem:[#allocation3 + $0x8] sm:$0xff] %vm285_vm2, %v815_v13 }
  0x3b   : > { %588 = vmatmul.mubr.msk.bf16.vlgmr.msra.gmra.mxu0 %vm215_vm1, %v682_v6 }
  0x3f   : > { %v328_v20 = vld [vmem:[#allocation2] sm:$0xff]  ;;  %v329_v41 = vld [vmem:[#allocation2 + $0x8] sm:$0xff] }
  0x40   : > { %v341_v46 = vld [vmem:[#allocation3] sm:$0xff]  ;;  %v342_v51 = vld [vmem:[#allocation3 + $0x8] sm:$0xff] }
  0xfb   : > { %v260_v7 = vpop.f32.mrf.mxu0 }
  0xfc   : > { %273 = vst [vmem:[#allocation5 + $0x10] sm:$0xff] %v260_v7 }
  0xfd   : > { %v262_v8 = vpop.f32.mrf.mxu0 }
  0xfe   : > { %274 = vst [vmem:[#allocation5] sm:$0xff] %v262_v8  ;;  %v290_v9 = vadd.f32 %v262_v8, %v260_v7 }
  0xff   : > { %v264_v10 = vpop.f32.mrf.mxu0 }
 0x100   : > { %275 = vst [vmem:[#allocation5 + $0x18] sm:$0xff] %v264_v10  ;;  %291 = vadd.xlane.f32.xlu0 %v290_v9 }
 0x101   : > { %v266_v11 = vpop.f32.mrf.mxu0 }
 0x102   : > { %276 = vst [vmem:[#allocation5 + $0x8] sm:$0xff] %v266_v11  ;;  %v293_v12 = vadd.f32 %v266_v11, %v264_v10 }
 0x104   : > { %294 = vadd.xlane.f32.xlu0 %v293_v12 }
 0x108   : > { %331 = vadd.xlane.f32.xlu0 %v290_v9 }
 0x189   : > { %v292_v14 = vpop.xlane.xlu0 %291 }
 0x18a   : > { %v297_v15 = vrot.slane %v292_v14, 4 }
 0x18c   : > { %v299_v16 = vadd.f32 %v297_v15, %v292_v14 }
 0x18d   : > { %v295_v17 = vpop.xlane.xlu0 %294 }
 0x18e   : > { %v300_v18 = vadd.f32 %v299_v16, %v295_v17  ;;  %v302_v19 = vrot.slane %v295_v17, 4 }
 0x190   : > { %v304_v21 = vadd.f32 %v302_v19, %v300_v18 }
 0x191   : > { %v332_v22 = vpop.xlane.xlu0 %331 }
 0x192   : > { %v305_v23 = vmul.f32 0.0009765625, %v304_v21  ;;  %v336_v24 = vadd.f32 %v332_v22, %v328_v20 }
 0x194   : > { %v307_v25 = vrot.slane %v305_v23, 4  ;;  %339 = vst.msk [vmem:[#allocation2] sm:$0xff] %vm285_vm2, %v336_v24 }
 0x196   : > { %v309_v26 = vsel %vm219_vm0, %v305_v23, %v307_v25 }
 0x197   : > { %310 = vst.msk [vmem:[#allocation4] sm:$0xff] %vm285_vm2, %v309_v26  ;;  %311 = vst.msk [vmem:[#allocation4 + $0x8] sm:$0xff] %vm285_vm2, %v309_v26 }
 0x19b   : > { %v361_v44 = vld [vmem:[#allocation2] sm:$0xff] }
 0x19c   : > { %v364_v45 = vrot.slane %v361_v44, 4 }
 0x19e   : > { %v312_v27 = vld [vmem:[#allocation4] sm:$0xff]  ;;  %v313_v28 = vld [vmem:[#allocation4 + $0x8] sm:$0xff]  ;;  %v366_v50 = vadd.f32 %v364_v45, %v361_v44 }
 0x19f   : > { %316 = vperm.xlu1 %680, %v312_v27  }
 0x1a3   : > { %321 = vperm.xlu1 %680, %v313_v28  }
 0x1c7   : > { %334 = vadd.xlane.f32.xlu1 %v293_v12 }
 0x21a   : > { %v317_v29 = vpop.permute.xlu1 %316 }
 0x21b   : > { %v324_v30 = vsub.f32 %v260_v7, %v317_v29  ;;  %v325_v31 = vsub.f32 %v262_v8, %v317_v29 }
 0x21d   : > { %v343_v32 = vmul.f32 %v324_v30, %v324_v30  ;;  %v344_v33 = vmul.f32 %v325_v31, %v325_v31 }
 0x21e   : > { %v322_v34 = vpop.permute.xlu1 %321 }
 0x21f   : > { %v326_v35 = vsub.f32 %v264_v10, %v322_v34  ;;  %v327_v36 = vsub.f32 %v266_v11, %v322_v34  ;;  %v347_v37 = vadd.f32 %v344_v33, %v343_v32 }
 0x221   : > { %v345_v38 = vmul.f32 %v326_v35, %v326_v35  ;;  %v346_v39 = vmul.f32 %v327_v36, %v327_v36  ;;  %348 = vadd.xlane.f32.xlu0 %v347_v37 }
 0x223   : > { %v350_v40 = vadd.f32 %v346_v39, %v345_v38 }
 0x225   : > { %351 = vadd.xlane.f32.xlu0 %v350_v40 }
 0x250   : > { %v335_v42 = vpop.xlane.xlu1 %334 }
 0x251   : > { %v337_v43 = vadd.f32 %v335_v42, %v329_v41 }
 0x253   : > { %340 = vst.msk [vmem:[#allocation2 + $0x8] sm:$0xff] %vm285_vm2, %v337_v43 }
 0x25a   : > { %v362_v48 = vld [vmem:[#allocation2 + $0x8] sm:$0xff] }
 0x25b   : > { %v367_v52 = vadd.f32 %v366_v50, %v362_v48  ;;  %v369_v53 = vrot.slane %v362_v48, 4 }
 0x25d   : > { %v371_v56 = vadd.f32 %v369_v53, %v367_v52 }
 0x25f   : > { %v372_v58 = vmul.f32 0.0009765625, %v371_v56 }
 0x261   : > { %v385_v62 = vsub.f32 %v372_v58, %v312_v27  ;;  %v397_v7 = vsub.f32 0.0, %v372_v58 }
 0x263   : > { %v386_v2 = vmul.f32 %v385_v62, %v385_v62 }
 0x2aa   : > { %v349_v47 = vpop.xlane.xlu0 %348 }
 0x2ab   : > { %v353_v49 = vadd.f32 %v349_v47, %v341_v46 }
 0x2ad   : > { %355 = vst.msk [vmem:[#allocation3] sm:$0xff] %vm285_vm2, %v353_v49 }
 0x2ae   : > { %v352_v54 = vpop.xlane.xlu0 %351 }
 0x2af   : > { %v354_v55 = vadd.f32 %v352_v54, %v342_v51 }
 0x2b1   : > { %356 = vst.msk [vmem:[#allocation3 + $0x8] sm:$0xff] %vm285_vm2, %v354_v55 }
 0x2b4   : > { %v373_v57 = vld [vmem:[#allocation3] sm:$0xff] }
 0x2b5   : > { %v376_v59 = vrot.slane %v373_v57, 4 }
 0x2b7   : > { %v378_v60 = vadd.f32 %v376_v59, %v373_v57 }
 0x2b8   : > { %v374_v61 = vld [vmem:[#allocation3 + $0x8] sm:$0xff] }
 0x2b9   : > { %v379_v63 = vadd.f32 %v378_v60, %v374_v61  ;;  %v381_v0 = vrot.slane %v374_v61, 4 }
 0x2bb   : > { %v383_v1 = vadd.f32 %v381_v0, %v379_v63 }
 0x2bd   : > { %v384_v3 = vmul.f32 0.0009765625, %v383_v1 }
 0x2bf   : > { %v387_v4 = vsub.f32 %v384_v3, %v386_v2 }
 0x2c1   : > { %v388_v5 = vmax.f32 %v387_v4, 0.0 }
 0x2c3   : > { %v389_v6 = vadd.f32 1e-05, %v388_v5 }
 0x2c5   : > { %683 = vrsqrt.f32 %v389_v6 }
 0x2d2   : > { %v684_v8 = vpop.eup %683 }
 0x2d3   : > { %v392_v9 = vrot.slane %v684_v8, 4  ;;  %v398_v10 = vmul.f32 %v684_v8, %v397_v7 }
 0x2d5   : > { %v394_v11 = vsel %vm219_vm0, %v684_v8, %v392_v9  ;;  %v400_v12 = vrot.slane %v398_v10, 4 }
 0x2d6   : > { %395 = vst.msk [vmem:[#allocation2] sm:$0xff] %vm285_vm2, %v394_v11  ;;  %396 = vst.msk [vmem:[#allocation2 + $0x8] sm:$0xff] %vm285_vm2, %v394_v11 }
 0x2d7   : > { %v402_v13 = vsel %vm219_vm0, %v398_v10, %v400_v12 }
 0x2d8   : > { %403 = vst.msk [vmem:[#allocation3] sm:$0xff] %vm285_vm2, %v402_v13  ;;  %404 = vst.msk [vmem:[#allocation3 + $0x8] sm:$0xff] %vm285_vm2, %v402_v13 }
 0x2d9 PF: > { %p589_p9 = scmp.ne.s32.totalorder %s795_s12, 1 }
 0x2db   : > { %408 = sbr.rel (%p589_p9) target bundleno = 875 (0x36b), region = 48 }
 0x2e0   : > { %v433_v14 = vld [vmem:[#allocation3] sm:$0xff]  ;;  %v417_v15 = vld [vmem:[#allocation2] sm:$0xff]  ;;  %v816_v16 = vmov 0   ;;  %v434_v17 = vld [vmem:[#allocation3 + $0x8] sm:$0xff] }
 0x2e1   : > { %686 = vset.pattern.permute.xlu1 %v816_v16  ;;  %685 = vset.pattern.permute.xlu0 %v816_v16  ;;  %v418_v18 = vld [vmem:[#allocation2 + $0x8] sm:$0xff]  ;;  %v413_v19 = vld [vmem:[#allocation5 + $0x10] sm:$0xff]  ;;  %v414_v20 = vld [vmem:[#allocation5] sm:$0xff] }
 0x2e2   : > { %437 = vperm.xlu1 %686, %v433_v14   ;;  %421 = vperm.xlu0 %685, %v417_v15   ;;  %v415_v25 = vld [vmem:[#allocation5 + $0x18] sm:$0xff]  ;;  %v416_v26 = vld [vmem:[#allocation5 + $0x8] sm:$0xff] }
 0x2e6   : > { %442 = vperm.xlu1 %686, %v434_v17   ;;  %426 = vperm.xlu0 %685, %v418_v18  }
 0x35d   : > { %v438_v21 = vpop.permute.xlu1 %437  ;;  %v422_v22 = vpop.permute.xlu0 %421 }
 0x35e   : > { %v429_v23 = vmul.f32 %v422_v22, %v413_v19  ;;  %v430_v24 = vmul.f32 %v422_v22, %v414_v20 }
 0x360   : > { %v445_v27 = vadd.f32 %v438_v21, %v429_v23  ;;  %v446_v28 = vadd.f32 %v438_v21, %v430_v24 }
 0x361   : > { %v427_v29 = vpop.permute.xlu0 %426  ;;  %v443_v34 = vpop.permute.xlu1 %442 }
 0x362   : > { %v449_v30 = vmul.f32 0.2, %v445_v27  ;;  %v450_v31 = vmul.f32 0.2, %v446_v28  ;;  %v431_v32 = vmul.f32 %v427_v29, %v415_v25  ;;  %v432_v33 = vmul.f32 %v427_v29, %v416_v26 }
 0x364   : > { %v453_v35 = vmax.f32 %v445_v27, %v449_v30  ;;  %v454_v36 = vmax.f32 %v446_v28, %v450_v31  ;;  %v447_v37 = vadd.f32 %v443_v34, %v431_v32  ;;  %v448_v38 = vadd.f32 %v443_v34, %v432_v33 }
 0x366   : > { %457 = vst [vmem:[%s943_s5] sm:$0xff] %v453_v35  ;;  %458 = vst [vmem:[%s943_s5 + $0x8] sm:$0xff] %v454_v36  ;;  %v451_v39 = vmul.f32 0.2, %v447_v37  ;;  %v452_v40 = vmul.f32 0.2, %v448_v38 }
 0x368   : > { %v455_v41 = vmax.f32 %v447_v37, %v451_v39  ;;  %v456_v42 = vmax.f32 %v448_v38, %v452_v40 }
 0x36a   : > { %459 = vst [vmem:[%s943_s5 + $0x10] sm:$0xff] %v455_v41  ;;  %460 = vst [vmem:[%s943_s5 + $0x18] sm:$0xff] %v456_v42 }
 0x36b PF: > { %s596_s12 = sshll.u32 %s799_s13, 9  ;;  %s478_s18 = sshll.u32 %s943_s5, 4  ;;  %s984_s18 = int_to_ptr.vmem [resolvable:$true] %s478_s18 }
 0x36c   : > { %s981_s17 = scalar_lea.hbm %s1039_s2, %s596_s12  ;;  %s462_s21 = scalar_lea.sflag [#allocation8], %s934_s22 }
 0x36d   : > { %s715_s25 = scalar_lea.vmem %s984_s18, 512  ;;  %s817_s29 = smov [#allocation9]  }
 0x36e   : > { %p716_p0 = scmp.ne.s32.totalorder %s984_s18, %s715_s25  ;;  %s719_s27 = sshll.u32 %s817_s29, 4  ;;  %s720_s27 = int_to_ptr.vmem [resolvable:$false] %s719_s27 }
 0x36f   : > { %s721_s13 = scalar_lea.vmem %s720_s27, 1024  ;;  %p722_p4 = scmp.lt.s32.totalorder %s984_s18, %s720_s27 }
 0x370   : > { %p717_p1 = pnand %p716_p0, %p898_p10  ;;  %p723_p5 = scmp.lt.s32.totalorder %s721_s13, %s715_s25 }
 0x372   : > { %p718_p2 = pneg %p717_p1  ;;  %p724_p6 = por %p723_p5, %p722_p4 }
 0x374   : > { %p725_p7 = pnand %p724_p6, %p718_p2 }
 0x376   : > { %728 = shalt.err (!%p725_p7)
}
 0x377   : > { %s729_s30 = scalar_lea.hbm %s981_s17, 512  ;;  %s733_s5 = scalar_lea.hbm %s1039_s2, 1024 }
 0x378   : > { %p730_p8 = scmp.ne.s32.totalorder %s981_s17, %s729_s30  ;;  %p734_p13 = scmp.lt.s32.totalorder %s981_s17, %s1039_s2 }
 0x379   : > { %p735_p11 = scmp.lt.s32.totalorder %s733_s5, %s729_s30 }
 0x37a   : > { %p731_p12 = pnand %p730_p8, %p898_p10 }
 0x37b   : > { %p736_p9 = por %p735_p11, %p734_p13 }
 0x37c   : > { %p732_p3 = pneg %p731_p12 }
 0x37e   : > { %p737_p0 = pnand %p736_p9, %p732_p3 }
 0x380   : > { %740 = shalt.err (!%p737_p0)
}
 0x381   : > { %s818_s12 = smov 256   ;;  %s819_s7 = smov 16  }
 0x382   : > { %599 = dma.vmem_to_hbm [thread:$0]  (%p898_p10), %s984_s18, 512, %s981_s17, %s462_s21, %s818_s12, %s818_s12, %s819_s7  }
 0x383 PF: > { %p610_p1 = scmp.ge.s32.totalorder %s811_s16, 2  ;;  %s493_s8 = sand.u32 1, %s783_s9  }
 0x384   : > { %p1045_p2 = scmp.ne.s32.totalorder %s1043_s26, 0  ;;  %s494_s25 = scalar_lea.sflag [#allocation8], %s493_s8 }
 0x386   : > { %p606_p4 = pnand %p610_p1, %p1045_p2 }
 0x388   : > { %p607_p5 = pneg %p606_p4 }
 0x38a   : > { %778 = dma.done.wait (%p607_p5), %s494_s25, 512  }
 0x38b   : > { %780 = vsyncadd (%p607_p5), %s494_s25, 4294966784  ;;  %s18_s16 = sadd.s32 1, %s811_s16   ;;  %s1046_s9 = smov %s787_s10 }
 0x38c   : > { %p15_p6 = scmp.ge.s32.totalorder %s18_s16, 6   ;;  %s1047_s10 = smov %s791_s11 }
 0x38d   : > { %s1048_s11 = smov %s911_s28  ;;  %s1049_s12 = smov %s803_s14 }
 0x38e   : > { %s1050_s13 = smov %s807_s15  ;;  %s1051_s14 = smov %s1054_s19 }
 0x38f   : > { %s1052_s15 = smov %s1058_s20  ;;  %17 = sbr.rel (!%p15_p6) target bundleno = 7 (0x7), region = 91 }
 0x394   :  { %499 = vsyncpa [#allocation7], 1 }
 0x395   :  { %501 = vsyncpa [#allocation7 + $0x1], 1 }
 0x396   :  { %502 = vsyncpa [#allocation8], 1 }
 0x397   :  { %504 = vsyncpa [#allocation8 + $0x1], 1 }

</bundles_post_ra>
